<compile_context>
chip_gen: v6e
topology: v6e:2x2x1
jax: 0.10.0
libtpu: 0.0.40
codegen_flags: <defaults>
</compile_context>

<pallas_src>
import functools

import jax
import jax.numpy as jnp
from jax.experimental import pallas as pl
from jax.experimental.pallas import tpu as pltpu

_LANES = 128
_SUBLANES = 8
_CHUNK_ROWS = 64  # 64x128 f32 = 8 vregs per stream in the fused inner loop


def _round_up(x, m):
    return ((x + m - 1) // m) * m


def _num_tensorcores():
    """Best-effort TC-per-device count (2 only on v7x-style megacore chips)."""
    try:
        kind = jax.devices()[0].device_kind.lower()
    except Exception:
        return 1
    return 2 if ("v7" in kind or "7x" in kind) else 1


def _make_dice_kernel(rows, block_rows, blocks_per_split, need_mask):
    """Kernel accumulating [sum(s*t), sum(s), sum(t)] partials per split.

    Hot loop: 64-row chunks, fused cast/sigmoid/mul/add into three (8, 128)
    vreg accumulators carried through a lax.fori_loop.  out_ref (one (8,128)
    vreg per channel) is updated once per grid step.
    """
    n_full = block_rows // _CHUNK_ROWS
    rem = block_rows - n_full * _CHUNK_ROWS  # multiple of 8 by construction

    def add_chunk(p_ref, t_ref, carry, start, nrows, row0, masked):
        acc_i, acc_p, acc_t = carry
        x = p_ref[pl.ds(start, nrows), :].astype(jnp.float32)
        tv = t_ref[pl.ds(start, nrows), :].astype(jnp.float32)
        # Exact sigmoid with a single EUP push (tanh) instead of exp+divide.
        s = 0.5 * jnp.tanh(0.5 * x) + 0.5
        if masked:
            rid = row0 + start + jax.lax.broadcasted_iota(
                jnp.int32, (nrows, _LANES), 0)
            valid = rid < rows
            s = jnp.where(valid, s, 0.0)
            tv = jnp.where(valid, tv, 0.0)
        st = s * tv
        # Fold (nrows, 128) -> (8, 128): three independent VPU add chains.
        for k in range(nrows // _SUBLANES):
            sl = slice(k * _SUBLANES, (k + 1) * _SUBLANES)
            acc_i = acc_i + st[sl]
            acc_p = acc_p + s[sl]
            acc_t = acc_t + tv[sl]
        return acc_i, acc_p, acc_t

    def block_partials(p_ref, t_ref, row0, masked):
        zero = jnp.zeros((_SUBLANES, _LANES), jnp.float32)
        carry = (zero, zero, zero)
        if n_full > 0:
            def body(c, carry):
                start = pl.multiple_of(c * _CHUNK_ROWS, _CHUNK_ROWS)
                return add_chunk(p_ref, t_ref, carry, start, _CHUNK_ROWS,
                                 row0, masked)
            carry = jax.lax.fori_loop(0, n_full, body, carry)
        if rem > 0:
            carry = add_chunk(p_ref, t_ref, carry, n_full * _CHUNK_ROWS, rem,
                              row0, masked)
        return carry

    def kernel(p_ref, t_ref, out_ref):
        i = pl.program_id(1)

        @pl.when(i == 0)
        def _init():
            out_ref[...] = jnp.zeros_like(out_ref)

        def flush(carry):
            acc_i, acc_p, acc_t = carry
            out_ref[0, 0] += acc_i   # intersection partials
            out_ref[0, 1] += acc_p   # sum(sigmoid(p)) partials
            out_ref[0, 2] += acc_t   # sum(targets) partials

        if not need_mask:
            flush(block_partials(p_ref, t_ref, 0, masked=False))
        else:
            row0 = (pl.program_id(0) * blocks_per_split + i) * block_rows
            block_is_full = row0 + block_rows <= rows

            @pl.when(block_is_full)
            def _full():
                flush(block_partials(p_ref, t_ref, row0, masked=False))

            @pl.when(jnp.logical_not(block_is_full))
            def _partial():
                flush(block_partials(p_ref, t_ref, row0, masked=True))

    return kernel


def _flatten_native(x, is_logits):
    """Flatten; keep the narrowest reasonable dtype to minimize HBM bytes."""
    x = x.reshape(-1)
    if is_logits:
        if not jnp.issubdtype(x.dtype, jnp.floating):
            x = x.astype(jnp.float32)      # sigmoid wants float logits
    elif x.dtype == jnp.bool_:
        x = x.astype(jnp.int8)             # 1 B/elem stream; f32 cast in-kernel
    return x


@functools.partial(jax.jit, static_argnames=("smooth", "max_block_rows"))
def dice_loss(preds, targets, smooth=1e-6, max_block_rows=8192):
    """Pallas-TPU equivalent of DiceLoss.forward (returns a float32 scalar)."""
    p = _flatten_native(preds, is_logits=True)
    t = _flatten_native(targets, is_logits=False)
    n = p.shape[0]

    tile = _SUBLANES * _LANES              # 1024 elements = one (8,128) vreg
    n_aligned = (n // tile) * tile

    if n_aligned == 0:
        # Tiny input: a kernel launch is not worth it.
        s = jax.nn.sigmoid(p.astype(jnp.float32))
        tf = t.astype(jnp.float32)
        sums = jnp.stack([jnp.sum(s * tf), jnp.sum(s), jnp.sum(tf)])
    else:
        rows = n_aligned // _LANES         # always a multiple of 8
        # Free reshape when numel is 1024-aligned; otherwise a cheap prefix
        # slice (no whole-array pad, no sigmoid(-inf) dependence).
        p2 = (p if n_aligned == n else p[:n_aligned]).reshape(rows, _LANES)
        t2 = (t if n_aligned == n else t[:n_aligned]).reshape(rows, _LANES)

        # Row block: 8192 rows (4 MiB f32 per input tile) amortizes the
        # ~0.35us per-grid-step cost even at v7x HBM speed.  Partial blocks
        # stay a multiple of the sublane packing of the narrowest dtype
        # (8 f32 / 16 bf16 / 32 int8).
        block_rows = min(max_block_rows, rows)
        if block_rows < rows:
            itemsize = min(p2.dtype.itemsize, t2.dtype.itemsize)
            sub = _SUBLANES * max(1, 4 // itemsize)
            block_rows = _round_up(block_rows, sub)
        total_blocks = pl.cdiv(rows, block_rows)

        # Real 2-TensorCore split on v7x via CORE_PARALLEL; plain sequential
        # grid on single-TC chips (v5e/v6e).
        if _num_tensorcores() >= 2 and total_blocks >= 2:
            num_splits = 2
            dim_sem = (pltpu.CORE_PARALLEL, pltpu.ARBITRARY)
        else:
            num_splits = 1
            dim_sem = ("arbitrary", "arbitrary")
        blocks_per_split = pl.cdiv(total_blocks, num_splits)
        need_mask = num_splits * blocks_per_split * block_rows != rows
        clamp = num_splits * blocks_per_split > total_blocks

        def in_index_map(c, i):
            b = c * blocks_per_split + i
            if clamp:  # overshoot steps re-read the last block; fully masked
                b = jnp.minimum(b, total_blocks - 1)
            return (b, 0)

        kernel = _make_dice_kernel(rows, block_rows, blocks_per_split,
                                   need_mask)

        # Double-buffered inputs + headroom; raises v5e's 16 MiB scoped
        # default so the big tile still compiles there (well under physical
        # VMEM on every generation).
        vmem_needed = (2 * 2 * block_rows * _LANES
                       * (p2.dtype.itemsize + t2.dtype.itemsize))
        vmem_limit = max(vmem_needed + (4 << 20), 32 << 20)

        partials = pl.pallas_call(
            kernel,
            out_shape=jax.ShapeDtypeStruct(
                (num_splits, 3, _SUBLANES, _LANES), jnp.float32),
            grid_spec=pltpu.PrefetchScalarGridSpec(
                num_scalar_prefetch=0,
                grid=(num_splits, blocks_per_split),
                in_specs=[
                    pl.BlockSpec((block_rows, _LANES), in_index_map),
                    pl.BlockSpec((block_rows, _LANES), in_index_map),
                ],
                out_specs=pl.BlockSpec(
                    (1, 3, _SUBLANES, _LANES), lambda c, i: (c, 0, 0, 0)),
            ),
            compiler_params=pltpu.CompilerParams(
                dimension_semantics=dim_sem,
                vmem_limit_bytes=int(vmem_limit),
            ),
        )(p2, t2)

        sums = jnp.sum(partials, axis=(0, 2, 3))  # [inter, p_sum, t_sum]

        if n_aligned < n:
            # <= 1023-element tail reduced with plain jnp (no full-array pad).
            tp = jax.nn.sigmoid(p[n_aligned:].astype(jnp.float32))
            tt = t[n_aligned:].astype(jnp.float32)
            sums = sums + jnp.stack(
                [jnp.sum(tp * tt), jnp.sum(tp), jnp.sum(tt)])

    dice = (2.0 * sums[0] + smooth) / (sums[1] + sums[2] + smooth)
    return (1.0 - dice).astype(jnp.float32)


def _reference_dice_loss(preds, targets, smooth=1e-6):
    p = jax.nn.sigmoid(preds.astype(jnp.float32)).reshape(-1)
    t = targets.astype(jnp.float32).reshape(-1)
    inter = jnp.sum(p * t)
    dice = (2.0 * inter + smooth) / (jnp.sum(p) + jnp.sum(t) + smooth)
    return 1.0 - dice


if __name__ == "__main__":
    key = jax.random.PRNGKey(0)
    k1, k2, k3, k4, k5, k6 = jax.random.split(key, 6)

    def check(loss, ref, tag):
        assert jnp.allclose(loss, ref, rtol=1e-5, atol=1e-6), (tag, loss, ref)

    # 1) Small (N, C, H, W) input, numel % 1024 == 0: copy-free reshape,
    #    single full-extent block, remainder-only chunk path.
    shape1 = (2, 4, 16, 16)
    p1 = jax.random.normal(k1, shape1, dtype=jnp.float32)
    t1 = (jax.random.uniform(k2, shape1) > 0.5).astype(jnp.float32)
    l1 = jax.block_until_ready(dice_loss(p1, t1))
    check(l1, _reference_dice_loss(p1, t1), "basic")

    # 2) Awkward numel + tiny block: aligned-prefix + jnp tail, multi-block
    #    grid with a partially-valid last block (in-kernel row mask).
    shape2 = (1, 5, 40, 40)  # 8000 elements -> 7168 aligned + 832 tail
    p2 = jax.random.normal(k3, shape2, dtype=jnp.float32)
    t2 = (jax.random.uniform(k4, shape2) > 0.5).astype(jnp.float32)
    l2 = jax.block_until_ready(dice_loss(p2, t2, max_block_rows=16))
    check(l2, _reference_dice_loss(p2, t2), "masked")

    # 3) Larger aligned input with bool targets (streamed as int8) and the
    #    fori_loop chunked-accumulation path (768 rows -> 12 chunks).
    shape3 = (2, 8, 64, 96)
    p3 = jax.random.normal(k5, shape3, dtype=jnp.float32)
    t3 = jax.random.uniform(k6, shape3) > 0.5
    l3 = jax.block_until_ready(dice_loss(p3, t3))
    check(l3, _reference_dice_loss(p3, t3), "int8-targets")

    # 4) bf16 logits streamed in native dtype (cast to f32 inside the kernel).
    p4 = p1.astype(jnp.bfloat16)
    l4 = jax.block_until_ready(dice_loss(p4, t1))
    check(l4, _reference_dice_loss(p4, t1), "bf16")

    print("KERNEL_OK")
</pallas_src>

<mosaic_0001>
module attributes {stable_mosaic.version = 11 : i64} {
  func.func @kernel(%arg0: i32, %arg1: i32, %arg2: memref<16x128xf32, #tpu.memory_space<vmem>>, %arg3: memref<16x128xf32, #tpu.memory_space<vmem>>, %arg4: memref<1x3x8x128xf32, #tpu.memory_space<vmem>>) attributes {dimension_semantics = [#tpu.dimension_semantics<arbitrary>, #tpu.dimension_semantics<arbitrary>], iteration_bounds = array<i64: 1, 1>, scalar_prefetch = 0 : i64, scratch_operands = 0 : i64, tpu.core_type = #tpu.core_type<tc>, window_params = [{transform_indices = @transform_0, window_bounds = array<i64: 16, 128>}, {transform_indices = @transform_1, window_bounds = array<i64: 16, 128>}, {transform_indices = @transform_2, window_bounds = array<i64: 1, 3, 8, 128>}]} {
    %c0_i32 = arith.constant 0 : i32
    %0 = arith.cmpi eq, %arg1, %c0_i32 : i32
    %1 = arith.extui %0 : i1 to i32
    %c0_i32_0 = arith.constant 0 : i32
    %2 = arith.cmpi ne, %1, %c0_i32_0 : i32
    scf.if %2 {
      %cst_29 = arith.constant 0.000000e+00 : f32
      %44 = vector.broadcast %cst_29 : f32 to vector<1x3x8x128xf32>
      %c0_30 = arith.constant 0 : index
      %c0_31 = arith.constant 0 : index
      %c0_32 = arith.constant 0 : index
      %c0_33 = arith.constant 0 : index
      %45 = vector.load %arg4[%c0_30, %c0_31, %c0_32, %c0_33] : memref<1x3x8x128xf32, #tpu.memory_space<vmem>>, vector<1x3x8x128xf32>
      tpu.vector_store %arg4[%c0_30, %c0_31, %c0_32, %c0_33], %44 {strides = array<i32>} : memref<1x3x8x128xf32, #tpu.memory_space<vmem>>, vector<1x3x8x128xf32>,
    } else {
    }
    %cst = arith.constant 0.000000e+00 : f32
    %3 = vector.broadcast %cst : f32 to vector<8x128xf32>
    %c0 = arith.constant 0 : index
    %c0_1 = arith.constant 0 : index
    %4 = vector.load %arg2[%c0, %c0_1] : memref<16x128xf32, #tpu.memory_space<vmem>>, vector<16x128xf32>
    %c0_2 = arith.constant 0 : index
    %c0_3 = arith.constant 0 : index
    %5 = vector.load %arg3[%c0_2, %c0_3] : memref<16x128xf32, #tpu.memory_space<vmem>>, vector<16x128xf32>
    %cst_4 = arith.constant 5.000000e-01 : f32
    %6 = vector.broadcast %cst_4 : f32 to vector<16x128xf32>
    %7 = arith.mulf %6, %4 : vector<16x128xf32>
    %8 = math.tanh %7 : vector<16x128xf32>
    %cst_5 = arith.constant 5.000000e-01 : f32
    %9 = vector.broadcast %cst_5 : f32 to vector<16x128xf32>
    %10 = arith.mulf %9, %8 : vector<16x128xf32>
    %cst_6 = arith.constant 5.000000e-01 : f32
    %11 = vector.broadcast %cst_6 : f32 to vector<16x128xf32>
    %12 = arith.addf %10, %11 : vector<16x128xf32>
    %13 = arith.mulf %12, %5 : vector<16x128xf32>
    %14 = vector.extract_strided_slice %13 {offsets = [0, 0], sizes = [8, 128], strides = [1, 1]} : vector<16x128xf32> to vector<8x128xf32>
    %15 = arith.addf %3, %14 : vector<8x128xf32>
    %16 = vector.extract_strided_slice %12 {offsets = [0, 0], sizes = [8, 128], strides = [1, 1]} : vector<16x128xf32> to vector<8x128xf32>
    %17 = arith.addf %3, %16 : vector<8x128xf32>
    %18 = vector.extract_strided_slice %5 {offsets = [0, 0], sizes = [8, 128], strides = [1, 1]} : vector<16x128xf32> to vector<8x128xf32>
    %19 = arith.addf %3, %18 : vector<8x128xf32>
    %20 = vector.extract_strided_slice %13 {offsets = [8, 0], sizes = [8, 128], strides = [1, 1]} : vector<16x128xf32> to vector<8x128xf32>
    %21 = arith.addf %15, %20 : vector<8x128xf32>
    %22 = vector.extract_strided_slice %12 {offsets = [8, 0], sizes = [8, 128], strides = [1, 1]} : vector<16x128xf32> to vector<8x128xf32>
    %23 = arith.addf %17, %22 : vector<8x128xf32>
    %24 = vector.extract_strided_slice %5 {offsets = [8, 0], sizes = [8, 128], strides = [1, 1]} : vector<16x128xf32> to vector<8x128xf32>
    %25 = arith.addf %19, %24 : vector<8x128xf32>
    %c0_7 = arith.constant 0 : index
    %c0_8 = arith.constant 0 : index
    %c0_9 = arith.constant 0 : index
    %c0_10 = arith.constant 0 : index
    %26 = vector.load %arg4[%c0_7, %c0_8, %c0_9, %c0_10] : memref<1x3x8x128xf32, #tpu.memory_space<vmem>>, vector<1x1x8x128xf32>
    %27 = vector.shape_cast %26 : vector<1x1x8x128xf32> to vector<8x128xf32>
    %28 = arith.addf %27, %21 : vector<8x128xf32>
    %c0_11 = arith.constant 0 : index
    %c0_12 = arith.constant 0 : index
    %c0_13 = arith.constant 0 : index
    %c0_14 = arith.constant 0 : index
    %29 = vector.load %arg4[%c0_11, %c0_12, %c0_13, %c0_14] : memref<1x3x8x128xf32, #tpu.memory_space<vmem>>, vector<1x1x8x128xf32>
    %30 = vector.shape_cast %29 : vector<1x1x8x128xf32> to vector<8x128xf32>
    %31 = vector.shape_cast %28 : vector<8x128xf32> to vector<1x1x8x128xf32>
    tpu.vector_store %arg4[%c0_11, %c0_12, %c0_13, %c0_14], %31 {strides = array<i32>} : memref<1x3x8x128xf32, #tpu.memory_space<vmem>>, vector<1x1x8x128xf32>,
    %c0_15 = arith.constant 0 : index
    %c1 = arith.constant 1 : index
    %c0_16 = arith.constant 0 : index
    %c0_17 = arith.constant 0 : index
    %32 = vector.load %arg4[%c0_15, %c1, %c0_16, %c0_17] : memref<1x3x8x128xf32, #tpu.memory_space<vmem>>, vector<1x1x8x128xf32>
    %33 = vector.shape_cast %32 : vector<1x1x8x128xf32> to vector<8x128xf32>
    %34 = arith.addf %33, %23 : vector<8x128xf32>
    %c0_18 = arith.constant 0 : index
    %c1_19 = arith.constant 1 : index
    %c0_20 = arith.constant 0 : index
    %c0_21 = arith.constant 0 : index
    %35 = vector.load %arg4[%c0_18, %c1_19, %c0_20, %c0_21] : memref<1x3x8x128xf32, #tpu.memory_space<vmem>>, vector<1x1x8x128xf32>
    %36 = vector.shape_cast %35 : vector<1x1x8x128xf32> to vector<8x128xf32>
    %37 = vector.shape_cast %34 : vector<8x128xf32> to vector<1x1x8x128xf32>
    tpu.vector_store %arg4[%c0_18, %c1_19, %c0_20, %c0_21], %37 {strides = array<i32>} : memref<1x3x8x128xf32, #tpu.memory_space<vmem>>, vector<1x1x8x128xf32>,
    %c0_22 = arith.constant 0 : index
    %c2 = arith.constant 2 : index
    %c0_23 = arith.constant 0 : index
    %c0_24 = arith.constant 0 : index
    %38 = vector.load %arg4[%c0_22, %c2, %c0_23, %c0_24] : memref<1x3x8x128xf32, #tpu.memory_space<vmem>>, vector<1x1x8x128xf32>
    %39 = vector.shape_cast %38 : vector<1x1x8x128xf32> to vector<8x128xf32>
    %40 = arith.addf %39, %25 : vector<8x128xf32>
    %c0_25 = arith.constant 0 : index
    %c2_26 = arith.constant 2 : index
    %c0_27 = arith.constant 0 : index
    %c0_28 = arith.constant 0 : index
    %41 = vector.load %arg4[%c0_25, %c2_26, %c0_27, %c0_28] : memref<1x3x8x128xf32, #tpu.memory_space<vmem>>, vector<1x1x8x128xf32>
    %42 = vector.shape_cast %41 : vector<1x1x8x128xf32> to vector<8x128xf32>
    %43 = vector.shape_cast %40 : vector<8x128xf32> to vector<1x1x8x128xf32>
    tpu.vector_store %arg4[%c0_25, %c2_26, %c0_27, %c0_28], %43 {strides = array<i32>} : memref<1x3x8x128xf32, #tpu.memory_space<vmem>>, vector<1x1x8x128xf32>,
    return
  }
  func.func @transform_0(%arg0: i32, %arg1: i32) -> (i32, i32) {
    %c1_i32 = arith.constant 1 : i32
    %0 = arith.muli %arg0, %c1_i32 : i32
    %1 = arith.addi %0, %arg1 : i32
    %c0_i32 = arith.constant 0 : i32
    %c0_i32_0 = arith.constant 0 : i32
    return %1, %c0_i32 : i32, i32
  }
  func.func @transform_1(%arg0: i32, %arg1: i32) -> (i32, i32) {
    %c1_i32 = arith.constant 1 : i32
    %0 = arith.muli %arg0, %c1_i32 : i32
    %1 = arith.addi %0, %arg1 : i32
    %c0_i32 = arith.constant 0 : i32
    %c0_i32_0 = arith.constant 0 : i32
    return %1, %c0_i32 : i32, i32
  }
  func.func @transform_2(%arg0: i32, %arg1: i32) -> (i32, i32, i32, i32) {
    %c0_i32 = arith.constant 0 : i32
    %c0_i32_0 = arith.constant 0 : i32
    %c0_i32_1 = arith.constant 0 : i32
    %c0_i32_2 = arith.constant 0 : i32
    return %arg0, %c0_i32, %c0_i32_0, %c0_i32_1 : i32, i32, i32, i32
  }
}

</mosaic_0001>

<bundles_post_ra>
// kernel: dice_loss.1
= control target key start
LH: loop header
LB: loop body
LE: loop exit
PB: predicated region body
PF: predicated region fallthrough
CT: control target
= control target key end

     0   :  { %s154_s0 = inlined_call_operand.vmem [shape: f32[16,128], index: 0, kind: input, shape index: {}]   ;;  %s155_s1 = inlined_call_operand.vmem [shape: f32[16,128], index: 1, kind: input, shape index: {}]   ;;  %s156_s2 = inlined_call_operand.vmem [shape: f32[1,3,8,128], index: 2, kind: output, shape index: {}]  }
   0x1   :  { %v62_v0 = vld [vmem:[%s154_s0] sm:$0xff]  ;;  %v63_v1 = vld [vmem:[%s154_s0 + $0x8] sm:$0xff] }
   0x2   :  { %v64_v2 = vld [vmem:[%s155_s1] sm:$0xff]  ;;  %v65_v3 = vld [vmem:[%s155_s1 + $0x8] sm:$0xff]  ;;  %v66_v4 = vmul.f32 0.5, %v62_v0  ;;  %v67_v5 = vmul.f32 0.5, %v63_v1 }
   0x3   :  { %v81_v6 = vadd.f32 %v65_v3, %v64_v2 }
   0x4   :  { %114 = vtanh.f32 %v66_v4 }
   0x5   :  { %116 = vtanh.f32 %v67_v5  ;;  %112 = vst [vmem:[%s156_s2 + $0x10] sm:$0xff] %v81_v6 }
  0x11   :  { %v115_v7 = vpop.eup %114 }
  0x12   :  { %v117_v8 = vpop.eup %116  ;;  %v70_v9 = vmul.f32 0.5, %v115_v7 }
  0x13   :  { %v71_v10 = vmul.f32 0.5, %v117_v8 }
  0x14   :  { %v72_v11 = vadd.f32 0.5, %v70_v9 }
  0x15   :  { %v73_v12 = vadd.f32 0.5, %v71_v10 }
  0x16   :  { %v74_v13 = vmul.f32 %v72_v11, %v64_v2 }
  0x17   :  { %v75_v14 = vmul.f32 %v73_v12, %v65_v3  ;;  %v80_v15 = vadd.f32 %v73_v12, %v72_v11 }
  0x19   :  { %v79_v16 = vadd.f32 %v75_v14, %v74_v13  ;;  %110 = vst [vmem:[%s156_s2 + $0x8] sm:$0xff] %v80_v15 }
  0x1b   :  { %84 = vst [vmem:[%s156_s2] sm:$0xff] %v79_v16 }

</bundles_post_ra>
